<compile_context>
chip_gen: v5e
topology: v5e:2x2
jax: 0.10.0
libtpu: 0.0.40
codegen_flags: <defaults>
</compile_context>

<pallas_src>
import functools

import jax
import jax.numpy as jnp
import numpy as np
from jax.experimental import pallas as pl
from jax.experimental.pallas import tpu as pltpu


# ---------------------------------------------------------------------------
# helpers
# ---------------------------------------------------------------------------
def _round_up(x, m):
    return (x + m - 1) // m * m


def _pick_tm(m, tm_max=512):
    """Row-tile: as large as possible (HBM roofline), >=2 grid steps when M
    allows (keeps both v7x TensorCores busy), 8-sublane granular."""
    if m <= 256:
        return _round_up(m, 8)
    return min(tm_max, _round_up((m + 1) // 2, 8))


# ---------------------------------------------------------------------------
# Kernel 1: fused GEMM
#   out = [relu]( x @ w  [+ x2 @ w2]  [+ residual]  + bias )
# BN scale is pre-folded into the weight columns -> epilogue is bias-only.
# bf16 operands, f32 MXU accumulation, residual added in f32.
# ---------------------------------------------------------------------------
def _gemm_kernel(x_ref, w_ref, b_ref, *rest, relu, second_mm, has_residual):
    o_ref = rest[-1]
    acc = jnp.dot(x_ref[...], w_ref[...], preferred_element_type=jnp.float32)
    i = 0
    if second_mm:                       # fused projection shortcut
        acc = acc + jnp.dot(rest[i][...], rest[i + 1][...],
                            preferred_element_type=jnp.float32)
        i += 2
    if has_residual:                    # identity shortcut
        acc = acc + rest[i][...].astype(jnp.float32)
        i += 1
    acc = acc + b_ref[...].astype(jnp.float32)
    if relu:
        acc = jnp.maximum(acc, 0.0)
    o_ref[...] = acc.astype(o_ref.dtype)


def fused_gemm(x, w, bias, *, x2=None, w2=None, residual=None, relu=True,
               out_dtype=jnp.float32, tm_max=512):
    M, K = x.shape
    Kw, N = w.shape
    assert K == Kw
    second = x2 is not None
    has_res = residual is not None

    tm = _pick_tm(M, tm_max)
    Mp = _round_up(M, tm)
    if Mp != M:                                   # pad rows instead of assert
        padr = ((0, Mp - M), (0, 0))
        x = jnp.pad(x, padr)
        if second:
            x2 = jnp.pad(x2, padr)
        if has_res:
            residual = jnp.pad(residual, padr)

    in_specs = [
        pl.BlockSpec((tm, K), lambda i: (i, 0)),      # activation row tile
        pl.BlockSpec((K, N), lambda i: (0, 0)),       # resident weights
        pl.BlockSpec((1, N), lambda i: (0, 0)),       # folded BN bias
    ]
    args = [x, w, bias]
    flops = 2 * Mp * K * N
    if second:
        K2 = x2.shape[1]
        in_specs += [pl.BlockSpec((tm, K2), lambda i: (i, 0)),
                     pl.BlockSpec((K2, N), lambda i: (0, 0))]
        args += [x2, w2]
        flops += 2 * Mp * K2 * N
    if has_res:
        in_specs.append(pl.BlockSpec((tm, N), lambda i: (i, 0)))
        args.append(residual)

    out_itemsize = np.dtype(out_dtype).itemsize
    bytes_accessed = int(sum(a.size * a.dtype.itemsize for a in args)
                         + Mp * N * out_itemsize)

    kernel = functools.partial(_gemm_kernel, relu=relu, second_mm=second,
                               has_residual=has_res)
    out = pl.pallas_call(
        kernel,
        out_shape=jax.ShapeDtypeStruct((Mp, N), out_dtype),
        grid_spec=pltpu.PrefetchScalarGridSpec(
            num_scalar_prefetch=0,
            grid=(Mp // tm,),
            in_specs=in_specs,
            out_specs=pl.BlockSpec((tm, N), lambda i: (i, 0)),
        ),
        compiler_params=pltpu.CompilerParams(
            dimension_semantics=("parallel",),
            vmem_limit_bytes=32 * 1024 * 1024),
        cost_estimate=pl.CostEstimate(flops=flops, transcendentals=0,
                                      bytes_accessed=bytes_accessed),
    )(*args)
    return out[:M] if Mp != M else out


# ---------------------------------------------------------------------------
# Kernel 2: 3x3 conv (padded input) + folded-BN bias + ReLU, no HBM im2col.
# Grid over batch images; per output row, 9 tap matmuls accumulate in f32.
# Weight taps are hoisted out of the row loop (resident vregs/VMEM reads).
# ---------------------------------------------------------------------------
def _conv3x3_kernel(xp_ref, w_ref, b_ref, o_ref, *, stride, out_h, out_w,
                    col_start):
    bias = b_ref[...].astype(jnp.float32)                 # (1, P)
    w_taps = [w_ref[t] for t in range(9)]                 # hoisted VMEM loads

    @pl.loop(0, out_h)
    def _(oh):
        row0 = oh * stride
        acc = jnp.zeros((out_w, w_taps[0].shape[-1]), jnp.float32)
        for dh in range(3):
            for dw in range(3):
                patch = xp_ref[row0 + dh, pl.ds(col_start[dw], out_w), :]
                acc = acc + jnp.dot(patch, w_taps[dh * 3 + dw],
                                    preferred_element_type=jnp.float32)
        o_ref[oh] = jnp.maximum(acc + bias, 0.0).astype(o_ref.dtype)


def conv3x3_bn_relu(xp, w9, bias, *, stride):
    """xp: (N, H+2, W+2, C) padded NHWC; w9: (9, C, P) tap-major weights."""
    Nb, Hp, Wp, C = xp.shape
    P = w9.shape[-1]
    Ho = (Hp - 3) // stride + 1
    Wo = (Wp - 3) // stride + 1

    if stride == 1:
        xr, col_start = xp, (0, 1, 2)
    else:
        # De-interleave columns by stride-phase so each tap reads a contiguous
        # column window inside the kernel (avoids strided vector loads).
        phases = [xp[:, :, j::stride, :] for j in range(stride)]
        starts, off = [], 0
        for ph in phases:
            starts.append(off)
            off += ph.shape[2]
        xr = jnp.concatenate(phases, axis=2)
        col_start = tuple(starts[dw % stride] + dw // stride for dw in range(3))
    Wr = xr.shape[2]

    kernel = functools.partial(_conv3x3_kernel, stride=stride, out_h=Ho,
                               out_w=Wo, col_start=col_start)
    bytes_accessed = int(xr.size * xr.dtype.itemsize
                         + w9.size * w9.dtype.itemsize
                         + bias.size * bias.dtype.itemsize
                         + Nb * Ho * Wo * P * 2)
    return pl.pallas_call(
        kernel,
        out_shape=jax.ShapeDtypeStruct((Nb, Ho, Wo, P), jnp.bfloat16),
        grid_spec=pltpu.PrefetchScalarGridSpec(
            num_scalar_prefetch=0,
            grid=(Nb,),
            in_specs=[
                pl.BlockSpec((None, Hp, Wr, C), lambda n: (n, 0, 0, 0)),
                pl.BlockSpec((9, C, P), lambda n: (0, 0, 0)),
                pl.BlockSpec((1, P), lambda n: (0, 0)),
            ],
            out_specs=pl.BlockSpec((None, Ho, Wo, P), lambda n: (n, 0, 0, 0)),
        ),
        compiler_params=pltpu.CompilerParams(
            dimension_semantics=("parallel",),
            vmem_limit_bytes=32 * 1024 * 1024),
        cost_estimate=pl.CostEstimate(
            flops=2 * Nb * Ho * Wo * 9 * C * P,
            transcendentals=0,
            bytes_accessed=bytes_accessed),
    )(xr, w9, bias)


# ---------------------------------------------------------------------------
# Parameters: raw PyTorch-layout params + preparation (fold BN, bf16, layouts)
# ---------------------------------------------------------------------------
def init_bottleneck_params(key, in_planes, planes, stride, expansion=4):
    """Raw parameters in PyTorch layouts (conv OIHW, BN gamma/beta/mean/var)."""
    ks = jax.random.split(key, 8)
    out_planes = expansion * planes

    def bn(k, c):
        k1, k2, k3, k4 = jax.random.split(k, 4)
        gamma = 1.0 + 0.1 * jax.random.normal(k1, (c,), jnp.float32)
        beta = 0.1 * jax.random.normal(k2, (c,), jnp.float32)
        mean = 0.1 * jax.random.normal(k3, (c,), jnp.float32)
        var = 1.0 + 0.1 * jnp.abs(jax.random.normal(k4, (c,), jnp.float32))
        return gamma, beta, mean, var

    raw = {
        "w1": 0.1 * jax.random.normal(ks[0], (planes, in_planes, 1, 1), jnp.float32),
        "w2": 0.1 * jax.random.normal(ks[1], (planes, planes, 3, 3), jnp.float32),
        "w3": 0.1 * jax.random.normal(ks[2], (out_planes, planes, 1, 1), jnp.float32),
        "bn1": bn(ks[3], planes),
        "bn2": bn(ks[4], planes),
        "bn3": bn(ks[5], out_planes),
    }
    if stride != 1 or in_planes != out_planes:
        raw["ws"] = 0.1 * jax.random.normal(ks[6], (out_planes, in_planes, 1, 1),
                                            jnp.float32)
        raw["bns"] = bn(ks[7], out_planes)
    return raw


def prepare_params(raw, eps=1e-5):
    """Fold inference BN into weights (scale) / bias, matmul layouts, bf16."""
    def fold(g, b, m, v):
        scale = g / jnp.sqrt(v + eps)
        return scale, b - m * scale

    s1, b1 = fold(*raw["bn1"])
    s2, b2 = fold(*raw["bn2"])
    s3, b3 = fold(*raw["bn3"])
    c2 = raw["w2"].shape[1]
    p = {
        "w1": (raw["w1"][:, :, 0, 0].T * s1[None, :]).astype(jnp.bfloat16),
        "b1": b1[None, :],
        "w2": (jnp.transpose(raw["w2"], (2, 3, 1, 0)).reshape(9, c2, -1)
               * s2[None, None, :]).astype(jnp.bfloat16),
        "b2": b2[None, :],
        "w3": (raw["w3"][:, :, 0, 0].T * s3[None, :]).astype(jnp.bfloat16),
        "b3": b3[None, :],
    }
    if "ws" in raw:
        ss, bs = fold(*raw["bns"])
        p["ws"] = (raw["ws"][:, :, 0, 0].T * ss[None, :]).astype(jnp.bfloat16)
        # Pre-fold the two output-side biases (conv3's BN + shortcut BN) so the
        # final fused kernel sees a single bias vector.
        p["b3s"] = p["b3"] + bs[None, :]
    return p


# ---------------------------------------------------------------------------
# Bottleneck forward
# ---------------------------------------------------------------------------
def bottleneck_forward_nhwc(x_nhwc, params, stride):
    Nb, H, W, Cin = x_nhwc.shape
    planes = params["w1"].shape[1]
    Cout = params["w3"].shape[1]
    x_bf = x_nhwc.astype(jnp.bfloat16)

    # conv1 (1x1) + bn1 + relu
    y1 = fused_gemm(x_bf.reshape(Nb * H * W, Cin), params["w1"], params["b1"],
                    relu=True, out_dtype=jnp.bfloat16)
    y1 = y1.reshape(Nb, H, W, planes)

    # conv2 (3x3, stride, pad=1) + bn2 + relu — in-kernel taps, no HBM im2col
    y1p = jnp.pad(y1, ((0, 0), (1, 1), (1, 1), (0, 0)))
    y2 = conv3x3_bn_relu(y1p, params["w2"], params["b2"], stride=stride)
    Ho, Wo = y2.shape[1], y2.shape[2]
    M2 = Nb * Ho * Wo
    y2f = y2.reshape(M2, planes)

    # conv3 (1x1) + bn3 + shortcut + final relu, all fused in one kernel
    if "ws" in params:
        xs = x_bf[:, ::stride, ::stride, :].reshape(M2, Cin)
        out = fused_gemm(y2f, params["w3"], params["b3s"],
                         x2=xs, w2=params["ws"], relu=True,
                         out_dtype=jnp.float32)
    else:
        res = x_nhwc.reshape(M2, Cout)            # identity shortcut in f32
        out = fused_gemm(y2f, params["w3"], params["b3"],
                         residual=res, relu=True, out_dtype=jnp.float32)
    return out.reshape(Nb, Ho, Wo, Cout)


def bottleneck_forward(x_nchw, params, stride):
    x = jnp.transpose(x_nchw, (0, 2, 3, 1))       # NCHW -> NHWC (module boundary)
    out = bottleneck_forward_nhwc(x, params, stride)
    return jnp.transpose(out, (0, 3, 1, 2))       # NHWC -> NCHW


# ---------------------------------------------------------------------------
# Pure-XLA f32 reference (independent of the kernel layout logic)
# ---------------------------------------------------------------------------
def _reference_forward(x_nchw, raw, stride, eps=1e-5):
    def bn(y, p):
        g, b, m, v = p
        inv = g / jnp.sqrt(v + eps)
        return y * inv[None, :, None, None] + (b - m * inv)[None, :, None, None]

    def conv(y, w, s=1, pad=0):
        return jax.lax.conv_general_dilated(
            y, w, (s, s), [(pad, pad), (pad, pad)],
            dimension_numbers=("NCHW", "OIHW", "NCHW"))

    out = jax.nn.relu(bn(conv(x_nchw, raw["w1"]), raw["bn1"]))
    out = jax.nn.relu(bn(conv(out, raw["w2"], stride, 1), raw["bn2"]))
    out = bn(conv(out, raw["w3"]), raw["bn3"])
    sc = bn(conv(x_nchw, raw["ws"], stride), raw["bns"]) if "ws" in raw else x_nchw
    return jax.nn.relu(out + sc)


# ---------------------------------------------------------------------------
if __name__ == "__main__":
    root = jax.random.PRNGKey(0)
    kp1, kx1, kp2, kx2 = jax.random.split(root, 4)

    fwd = jax.jit(bottleneck_forward, static_argnums=2)

    # Case 1: projection shortcut (stride=2, channel expansion) — fused 2-matmul
    # epilogue kernel path.
    # Case 2: identity shortcut (stride=1, in_planes == 4*planes) — residual-add
    # kernel path.
    cases = [
        ("projection", 64, 32, 2, 2, 16, 16, kp1, kx1),
        ("identity", 128, 32, 1, 2, 8, 8, kp2, kx2),
    ]

    for name, in_planes, planes, stride, batch, H, W, kp, kx in cases:
        raw = init_bottleneck_params(kp, in_planes, planes, stride)
        params = prepare_params(raw)
        x = jax.random.normal(kx, (batch, in_planes, H, W), jnp.float32)

        out = fwd(x, params, stride)
        jax.block_until_ready(out)

        exp_shape = (batch, 4 * planes, H // stride, W // stride)
        assert out.shape == exp_shape, (name, out.shape, exp_shape)
        assert bool(jnp.all(out >= 0.0)), f"{name}: final ReLU violated"

        ref = _reference_forward(x, raw, stride)
        err = float(jnp.max(jnp.abs(out.astype(jnp.float32) - ref)))
        assert err < 0.25, f"{name}: max |pallas - f32 reference| too large: {err}"

    print("KERNEL_OK")
</pallas_src>

<mosaic_0001>
module attributes {stable_mosaic.version = 11 : i64} {
  func.func @_gemm_kernel(%arg0: i32, %arg1: memref<256x64xbf16, #tpu.memory_space<vmem>>, %arg2: memref<64x32xbf16, #tpu.memory_space<vmem>>, %arg3: memref<1x32xf32, #tpu.memory_space<vmem>>, %arg4: memref<256x32xbf16, #tpu.memory_space<vmem>>) attributes {dimension_semantics = [#tpu.dimension_semantics<parallel>], iteration_bounds = array<i64: 2>, scalar_prefetch = 0 : i64, scratch_operands = 0 : i64, tpu.core_type = #tpu.core_type<tc>, window_params = [{transform_indices = @transform_0, window_bounds = array<i64: 256, 64>}, {pipeline_mode = #tpu.pipeline_mode<synchronous>, transform_indices = @transform_1, window_bounds = array<i64: 64, 32>}, {pipeline_mode = #tpu.pipeline_mode<synchronous>, transform_indices = @transform_2, window_bounds = array<i64: 1, 32>}, {transform_indices = @transform_3, window_bounds = array<i64: 256, 32>}]} {
    %c0 = arith.constant 0 : index
    %c0_0 = arith.constant 0 : index
    %0 = vector.load %arg1[%c0, %c0_0] : memref<256x64xbf16, #tpu.memory_space<vmem>>, vector<256x64xbf16>
    %c0_1 = arith.constant 0 : index
    %c0_2 = arith.constant 0 : index
    %1 = vector.load %arg2[%c0_1, %c0_2] : memref<64x32xbf16, #tpu.memory_space<vmem>>, vector<64x32xbf16>
    %cst = arith.constant dense<0.000000e+00> : vector<256x32xf32>
    %2 = tpu.matmul %0, %1, %cst {dimension_numbers = #tpu.dot_dimension_numbers<[1], [0], [0], [1], [0, 0, 1, 1], [], []>} : vector<256x64xbf16>, vector<64x32xbf16>, vector<256x32xf32> -> vector<256x32xf32>
    %c0_3 = arith.constant 0 : index
    %c0_4 = arith.constant 0 : index
    %3 = vector.load %arg3[%c0_3, %c0_4] : memref<1x32xf32, #tpu.memory_space<vmem>>, vector<1x32xf32>
    %4 = vector.broadcast %3 : vector<1x32xf32> to vector<256x32xf32>
    %5 = arith.addf %2, %4 : vector<256x32xf32>
    %cst_5 = arith.constant 0.000000e+00 : f32
    %6 = vector.broadcast %cst_5 : f32 to vector<256x32xf32>
    %7 = arith.maximumf %5, %6 : vector<256x32xf32>
    %8 = arith.truncf %7 : vector<256x32xf32> to vector<256x32xbf16>
    %c0_6 = arith.constant 0 : index
    %c0_7 = arith.constant 0 : index
    %9 = vector.load %arg4[%c0_6, %c0_7] : memref<256x32xbf16, #tpu.memory_space<vmem>>, vector<256x32xbf16>
    tpu.vector_store %arg4[%c0_6, %c0_7], %8 {strides = array<i32>} : memref<256x32xbf16, #tpu.memory_space<vmem>>, vector<256x32xbf16>,
    return
  }
  func.func @transform_0(%arg0: i32) -> (i32, i32) {
    %c0_i32 = arith.constant 0 : i32
    %c0_i32_0 = arith.constant 0 : i32
    return %arg0, %c0_i32 : i32, i32
  }
  func.func @transform_1(%arg0: i32) -> (i32, i32) {
    %c0_i32 = arith.constant 0 : i32
    %c0_i32_0 = arith.constant 0 : i32
    %c0_i32_1 = arith.constant 0 : i32
    return %c0_i32, %c0_i32_0 : i32, i32
  }
  func.func @transform_2(%arg0: i32) -> (i32, i32) {
    %c0_i32 = arith.constant 0 : i32
    %c0_i32_0 = arith.constant 0 : i32
    %c0_i32_1 = arith.constant 0 : i32
    return %c0_i32, %c0_i32_0 : i32, i32
  }
  func.func @transform_3(%arg0: i32) -> (i32, i32) {
    %c0_i32 = arith.constant 0 : i32
    %c0_i32_0 = arith.constant 0 : i32
    return %arg0, %c0_i32 : i32, i32
  }
}

module attributes {stable_mosaic.version = 11 : i64} {
  func.func @_conv3x3_kernel(%arg0: i32, %arg1: memref<1x18x18x32xbf16, #tpu.memory_space<vmem>>, %arg2: memref<9x32x32xbf16, #tpu.memory_space<vmem>>, %arg3: memref<1x32xf32, #tpu.memory_space<vmem>>, %arg4: memref<1x8x8x32xbf16, #tpu.memory_space<vmem>>) attributes {dimension_semantics = [#tpu.dimension_semantics<parallel>], iteration_bounds = array<i64: 2>, scalar_prefetch = 0 : i64, scratch_operands = 0 : i64, tpu.core_type = #tpu.core_type<tc>, window_params = [{transform_indices = @transform_0, window_bounds = array<i64: 1, 18, 18, 32>}, {pipeline_mode = #tpu.pipeline_mode<synchronous>, transform_indices = @transform_1, window_bounds = array<i64: 9, 32, 32>}, {pipeline_mode = #tpu.pipeline_mode<synchronous>, transform_indices = @transform_2, window_bounds = array<i64: 1, 32>}, {transform_indices = @transform_3, window_bounds = array<i64: 1, 8, 8, 32>}]} {
    %c0 = arith.constant 0 : index
    %c0_0 = arith.constant 0 : index
    %0 = vector.load %arg3[%c0, %c0_0] : memref<1x32xf32, #tpu.memory_space<vmem>>, vector<1x32xf32>
    %c0_1 = arith.constant 0 : index
    %c0_2 = arith.constant 0 : index
    %c0_3 = arith.constant 0 : index
    %1 = vector.load %arg2[%c0_1, %c0_2, %c0_3] : memref<9x32x32xbf16, #tpu.memory_space<vmem>>, vector<1x32x32xbf16>
    %2 = vector.shape_cast %1 : vector<1x32x32xbf16> to vector<32x32xbf16>
    %c1 = arith.constant 1 : index
    %c0_4 = arith.constant 0 : index
    %c0_5 = arith.constant 0 : index
    %3 = vector.load %arg2[%c1, %c0_4, %c0_5] : memref<9x32x32xbf16, #tpu.memory_space<vmem>>, vector<1x32x32xbf16>
    %4 = vector.shape_cast %3 : vector<1x32x32xbf16> to vector<32x32xbf16>
    %c2 = arith.constant 2 : index
    %c0_6 = arith.constant 0 : index
    %c0_7 = arith.constant 0 : index
    %5 = vector.load %arg2[%c2, %c0_6, %c0_7] : memref<9x32x32xbf16, #tpu.memory_space<vmem>>, vector<1x32x32xbf16>
    %6 = vector.shape_cast %5 : vector<1x32x32xbf16> to vector<32x32xbf16>
    %c3 = arith.constant 3 : index
    %c0_8 = arith.constant 0 : index
    %c0_9 = arith.constant 0 : index
    %7 = vector.load %arg2[%c3, %c0_8, %c0_9] : memref<9x32x32xbf16, #tpu.memory_space<vmem>>, vector<1x32x32xbf16>
    %8 = vector.shape_cast %7 : vector<1x32x32xbf16> to vector<32x32xbf16>
    %c4 = arith.constant 4 : index
    %c0_10 = arith.constant 0 : index
    %c0_11 = arith.constant 0 : index
    %9 = vector.load %arg2[%c4, %c0_10, %c0_11] : memref<9x32x32xbf16, #tpu.memory_space<vmem>>, vector<1x32x32xbf16>
    %10 = vector.shape_cast %9 : vector<1x32x32xbf16> to vector<32x32xbf16>
    %c5 = arith.constant 5 : index
    %c0_12 = arith.constant 0 : index
    %c0_13 = arith.constant 0 : index
    %11 = vector.load %arg2[%c5, %c0_12, %c0_13] : memref<9x32x32xbf16, #tpu.memory_space<vmem>>, vector<1x32x32xbf16>
    %12 = vector.shape_cast %11 : vector<1x32x32xbf16> to vector<32x32xbf16>
    %c6 = arith.constant 6 : index
    %c0_14 = arith.constant 0 : index
    %c0_15 = arith.constant 0 : index
    %13 = vector.load %arg2[%c6, %c0_14, %c0_15] : memref<9x32x32xbf16, #tpu.memory_space<vmem>>, vector<1x32x32xbf16>
    %14 = vector.shape_cast %13 : vector<1x32x32xbf16> to vector<32x32xbf16>
    %c7 = arith.constant 7 : index
    %c0_16 = arith.constant 0 : index
    %c0_17 = arith.constant 0 : index
    %15 = vector.load %arg2[%c7, %c0_16, %c0_17] : memref<9x32x32xbf16, #tpu.memory_space<vmem>>, vector<1x32x32xbf16>
    %16 = vector.shape_cast %15 : vector<1x32x32xbf16> to vector<32x32xbf16>
    %c8 = arith.constant 8 : index
    %c0_18 = arith.constant 0 : index
    %c0_19 = arith.constant 0 : index
    %17 = vector.load %arg2[%c8, %c0_18, %c0_19] : memref<9x32x32xbf16, #tpu.memory_space<vmem>>, vector<1x32x32xbf16>
    %18 = vector.shape_cast %17 : vector<1x32x32xbf16> to vector<32x32xbf16>
    %c0_i32 = arith.constant 0 : i32
    %c8_i32 = arith.constant 8 : i32
    %19 = arith.addi %c0_i32, %c8_i32 : i32
    %c1_i32 = arith.constant 1 : i32
    scf.for %arg5 = %c0_i32 to %19 step %c1_i32  : i32 {
      %c1_i32_21 = arith.constant 1 : i32
      %20 = arith.muli %arg5, %c1_i32_21 : i32
      %c0_i32_22 = arith.constant 0 : i32
      %21 = arith.addi %c0_i32_22, %20 : i32
      %c2_i32 = arith.constant 2 : i32
      %22 = arith.muli %21, %c2_i32 : i32
      %cst = arith.constant 0.000000e+00 : f32
      %23 = vector.broadcast %cst : f32 to vector<8x32xf32>
      %c0_i32_23 = arith.constant 0 : i32
      %24 = arith.addi %22, %c0_i32_23 : i32
      %c0_24 = arith.constant 0 : index
      %25 = arith.index_cast %24 : i32 to index
      %c0_25 = arith.constant 0 : index
      %c0_26 = arith.constant 0 : index
      %26 = vector.load %arg1[%c0_24, %25, %c0_25, %c0_26] : memref<1x18x18x32xbf16, #tpu.memory_space<vmem>>, vector<1x1x8x32xbf16>
      %27 = vector.shape_cast %26 : vector<1x1x8x32xbf16> to vector<8x32xbf16>
      %cst_27 = arith.constant dense<0.000000e+00> : vector<8x32xf32>
      %28 = tpu.matmul %27, %2, %cst_27 {dimension_numbers = #tpu.dot_dimension_numbers<[1], [0], [0], [1], [0, 0, 1, 1], [], []>} : vector<8x32xbf16>, vector<32x32xbf16>, vector<8x32xf32> -> vector<8x32xf32>
      %29 = arith.addf %23, %28 : vector<8x32xf32>
      %c0_i32_28 = arith.constant 0 : i32
      %30 = arith.addi %22, %c0_i32_28 : i32
      %c0_29 = arith.constant 0 : index
      %31 = arith.index_cast %30 : i32 to index
      %c9 = arith.constant 9 : index
      %c0_30 = arith.constant 0 : index
      %32 = vector.load %arg1[%c0_29, %31, %c9, %c0_30] : memref<1x18x18x32xbf16, #tpu.memory_space<vmem>>, vector<1x1x8x32xbf16>
      %33 = vector.shape_cast %32 : vector<1x1x8x32xbf16> to vector<8x32xbf16>
      %cst_31 = arith.constant dense<0.000000e+00> : vector<8x32xf32>
      %34 = tpu.matmul %33, %4, %cst_31 {dimension_numbers = #tpu.dot_dimension_numbers<[1], [0], [0], [1], [0, 0, 1, 1], [], []>} : vector<8x32xbf16>, vector<32x32xbf16>, vector<8x32xf32> -> vector<8x32xf32>
      %35 = arith.addf %29, %34 : vector<8x32xf32>
      %c0_i32_32 = arith.constant 0 : i32
      %36 = arith.addi %22, %c0_i32_32 : i32
      %c0_33 = arith.constant 0 : index
      %37 = arith.index_cast %36 : i32 to index
      %c1_34 = arith.constant 1 : index
      %c0_35 = arith.constant 0 : index
      %38 = vector.load %arg1[%c0_33, %37, %c1_34, %c0_35] : memref<1x18x18x32xbf16, #tpu.memory_space<vmem>>, vector<1x1x8x32xbf16>
      %39 = vector.shape_cast %38 : vector<1x1x8x32xbf16> to vector<8x32xbf16>
      %cst_36 = arith.constant dense<0.000000e+00> : vector<8x32xf32>
      %40 = tpu.matmul %39, %6, %cst_36 {dimension_numbers = #tpu.dot_dimension_numbers<[1], [0], [0], [1], [0, 0, 1, 1], [], []>} : vector<8x32xbf16>, vector<32x32xbf16>, vector<8x32xf32> -> vector<8x32xf32>
      %41 = arith.addf %35, %40 : vector<8x32xf32>
      %c1_i32_37 = arith.constant 1 : i32
      %42 = arith.addi %22, %c1_i32_37 : i32
      %c0_38 = arith.constant 0 : index
      %43 = arith.index_cast %42 : i32 to index
      %c0_39 = arith.constant 0 : index
      %c0_40 = arith.constant 0 : index
      %44 = vector.load %arg1[%c0_38, %43, %c0_39, %c0_40] : memref<1x18x18x32xbf16, #tpu.memory_space<vmem>>, vector<1x1x8x32xbf16>
      %45 = vector.shape_cast %44 : vector<1x1x8x32xbf16> to vector<8x32xbf16>
      %cst_41 = arith.constant dense<0.000000e+00> : vector<8x32xf32>
      %46 = tpu.matmul %45, %8, %cst_41 {dimension_numbers = #tpu.dot_dimension_numbers<[1], [0], [0], [1], [0, 0, 1, 1], [], []>} : vector<8x32xbf16>, vector<32x32xbf16>, vector<8x32xf32> -> vector<8x32xf32>
      %47 = arith.addf %41, %46 : vector<8x32xf32>
      %c1_i32_42 = arith.constant 1 : i32
      %48 = arith.addi %22, %c1_i32_42 : i32
      %c0_43 = arith.constant 0 : index
      %49 = arith.index_cast %48 : i32 to index
      %c9_44 = arith.constant 9 : index
      %c0_45 = arith.constant 0 : index
      %50 = vector.load %arg1[%c0_43, %49, %c9_44, %c0_45] : memref<1x18x18x32xbf16, #tpu.memory_space<vmem>>, vector<1x1x8x32xbf16>
      %51 = vector.shape_cast %50 : vector<1x1x8x32xbf16> to vector<8x32xbf16>
      %cst_46 = arith.constant dense<0.000000e+00> : vector<8x32xf32>
      %52 = tpu.matmul %51, %10, %cst_46 {dimension_numbers = #tpu.dot_dimension_numbers<[1], [0], [0], [1], [0, 0, 1, 1], [], []>} : vector<8x32xbf16>, vector<32x32xbf16>, vector<8x32xf32> -> vector<8x32xf32>
      %53 = arith.addf %47, %52 : vector<8x32xf32>
      %c1_i32_47 = arith.constant 1 : i32
      %54 = arith.addi %22, %c1_i32_47 : i32
      %c0_48 = arith.constant 0 : index
      %55 = arith.index_cast %54 : i32 to index
      %c1_49 = arith.constant 1 : index
      %c0_50 = arith.constant 0 : index
      %56 = vector.load %arg1[%c0_48, %55, %c1_49, %c0_50] : memref<1x18x18x32xbf16, #tpu.memory_space<vmem>>, vector<1x1x8x32xbf16>
      %57 = vector.shape_cast %56 : vector<1x1x8x32xbf16> to vector<8x32xbf16>
      %cst_51 = arith.constant dense<0.000000e+00> : vector<8x32xf32>
      %58 = tpu.matmul %57, %12, %cst_51 {dimension_numbers = #tpu.dot_dimension_numbers<[1], [0], [0], [1], [0, 0, 1, 1], [], []>} : vector<8x32xbf16>, vector<32x32xbf16>, vector<8x32xf32> -> vector<8x32xf32>
      %59 = arith.addf %53, %58 : vector<8x32xf32>
      %c2_i32_52 = arith.constant 2 : i32
      %60 = arith.addi %22, %c2_i32_52 : i32
      %c0_53 = arith.constant 0 : index
      %61 = arith.index_cast %60 : i32 to index
      %c0_54 = arith.constant 0 : index
      %c0_55 = arith.constant 0 : index
      %62 = vector.load %arg1[%c0_53, %61, %c0_54, %c0_55] : memref<1x18x18x32xbf16, #tpu.memory_space<vmem>>, vector<1x1x8x32xbf16>
      %63 = vector.shape_cast %62 : vector<1x1x8x32xbf16> to vector<8x32xbf16>
      %cst_56 = arith.constant dense<0.000000e+00> : vector<8x32xf32>
      %64 = tpu.matmul %63, %14, %cst_56 {dimension_numbers = #tpu.dot_dimension_numbers<[1], [0], [0], [1], [0, 0, 1, 1], [], []>} : vector<8x32xbf16>, vector<32x32xbf16>, vector<8x32xf32> -> vector<8x32xf32>
      %65 = arith.addf %59, %64 : vector<8x32xf32>
      %c2_i32_57 = arith.constant 2 : i32
      %66 = arith.addi %22, %c2_i32_57 : i32
      %c0_58 = arith.constant 0 : index
      %67 = arith.index_cast %66 : i32 to index
      %c9_59 = arith.constant 9 : index
      %c0_60 = arith.constant 0 : index
      %68 = vector.load %arg1[%c0_58, %67, %c9_59, %c0_60] : memref<1x18x18x32xbf16, #tpu.memory_space<vmem>>, vector<1x1x8x32xbf16>
      %69 = vector.shape_cast %68 : vector<1x1x8x32xbf16> to vector<8x32xbf16>
      %cst_61 = arith.constant dense<0.000000e+00> : vector<8x32xf32>
      %70 = tpu.matmul %69, %16, %cst_61 {dimension_numbers = #tpu.dot_dimension_numbers<[1], [0], [0], [1], [0, 0, 1, 1], [], []>} : vector<8x32xbf16>, vector<32x32xbf16>, vector<8x32xf32> -> vector<8x32xf32>
      %71 = arith.addf %65, %70 : vector<8x32xf32>
      %c2_i32_62 = arith.constant 2 : i32
      %72 = arith.addi %22, %c2_i32_62 : i32
      %c0_63 = arith.constant 0 : index
      %73 = arith.index_cast %72 : i32 to index
      %c1_64 = arith.constant 1 : index
      %c0_65 = arith.constant 0 : index
      %74 = vector.load %arg1[%c0_63, %73, %c1_64, %c0_65] : memref<1x18x18x32xbf16, #tpu.memory_space<vmem>>, vector<1x1x8x32xbf16>
      %75 = vector.shape_cast %74 : vector<1x1x8x32xbf16> to vector<8x32xbf16>
      %cst_66 = arith.constant dense<0.000000e+00> : vector<8x32xf32>
      %76 = tpu.matmul %75, %18, %cst_66 {dimension_numbers = #tpu.dot_dimension_numbers<[1], [0], [0], [1], [0, 0, 1, 1], [], []>} : vector<8x32xbf16>, vector<32x32xbf16>, vector<8x32xf32> -> vector<8x32xf32>
      %77 = arith.addf %71, %76 : vector<8x32xf32>
      %78 = vector.broadcast %0 : vector<1x32xf32> to vector<8x32xf32>
      %79 = arith.addf %77, %78 : vector<8x32xf32>
      %cst_67 = arith.constant 0.000000e+00 : f32
      %80 = vector.broadcast %cst_67 : f32 to vector<8x32xf32>
      %81 = arith.maximumf %79, %80 : vector<8x32xf32>
      %82 = arith.truncf %81 : vector<8x32xf32> to vector<8x32xbf16>
      %c0_68 = arith.constant 0 : index
      %83 = arith.index_cast %21 : i32 to index
      %c0_69 = arith.constant 0 : index
      %c0_70 = arith.constant 0 : index
      %84 = vector.load %arg4[%c0_68, %83, %c0_69, %c0_70] : memref<1x8x8x32xbf16, #tpu.memory_space<vmem>>, vector<1x1x8x32xbf16>
      %85 = vector.shape_cast %84 : vector<1x1x8x32xbf16> to vector<8x32xbf16>
      %86 = vector.shape_cast %82 : vector<8x32xbf16> to vector<1x1x8x32xbf16>
      tpu.vector_store %arg4[%c0_68, %83, %c0_69, %c0_70], %86 {strides = array<i32>} : memref<1x8x8x32xbf16, #tpu.memory_space<vmem>>, vector<1x1x8x32xbf16>,
    }
    %c8_i32_20 = arith.constant 8 : i32
    return
  }
  func.func @transform_0(%arg0: i32) -> (i32, i32, i32, i32) {
    %c0_i32 = arith.constant 0 : i32
    %c0_i32_0 = arith.constant 0 : i32
    %c0_i32_1 = arith.constant 0 : i32
    %c0_i32_2 = arith.constant 0 : i32
    return %arg0, %c0_i32, %c0_i32_0, %c0_i32_1 : i32, i32, i32, i32
  }
  func.func @transform_1(%arg0: i32) -> (i32, i32, i32) {
    %c0_i32 = arith.constant 0 : i32
    %c0_i32_0 = arith.constant 0 : i32
    %c0_i32_1 = arith.constant 0 : i32
    %c0_i32_2 = arith.constant 0 : i32
    return %c0_i32, %c0_i32_0, %c0_i32_1 : i32, i32, i32
  }
  func.func @transform_2(%arg0: i32) -> (i32, i32) {
    %c0_i32 = arith.constant 0 : i32
    %c0_i32_0 = arith.constant 0 : i32
    %c0_i32_1 = arith.constant 0 : i32
    return %c0_i32, %c0_i32_0 : i32, i32
  }
  func.func @transform_3(%arg0: i32) -> (i32, i32, i32, i32) {
    %c0_i32 = arith.constant 0 : i32
    %c0_i32_0 = arith.constant 0 : i32
    %c0_i32_1 = arith.constant 0 : i32
    %c0_i32_2 = arith.constant 0 : i32
    return %arg0, %c0_i32, %c0_i32_0, %c0_i32_1 : i32, i32, i32, i32
  }
}

module attributes {stable_mosaic.version = 11 : i64} {
  func.func @_gemm_kernel(%arg0: i32, %arg1: memref<128x32xbf16, #tpu.memory_space<vmem>>, %arg2: memref<32x128xbf16, #tpu.memory_space<vmem>>, %arg3: memref<1x128xf32, #tpu.memory_space<vmem>>, %arg4: memref<128x64xbf16, #tpu.memory_space<vmem>>, %arg5: memref<64x128xbf16, #tpu.memory_space<vmem>>, %arg6: memref<128x128xf32, #tpu.memory_space<vmem>>) attributes {dimension_semantics = [#tpu.dimension_semantics<parallel>], iteration_bounds = array<i64: 1>, scalar_prefetch = 0 : i64, scratch_operands = 0 : i64, tpu.core_type = #tpu.core_type<tc>, window_params = [{transform_indices = @transform_0, window_bounds = array<i64: 128, 32>}, {pipeline_mode = #tpu.pipeline_mode<synchronous>, transform_indices = @transform_1, window_bounds = array<i64: 32, 128>}, {pipeline_mode = #tpu.pipeline_mode<synchronous>, transform_indices = @transform_2, window_bounds = array<i64: 1, 128>}, {transform_indices = @transform_3, window_bounds = array<i64: 128, 64>}, {pipeline_mode = #tpu.pipeline_mode<synchronous>, transform_indices = @transform_4, window_bounds = array<i64: 64, 128>}, {transform_indices = @transform_5, window_bounds = array<i64: 128, 128>}]} {
    %c0 = arith.constant 0 : index
    %c0_0 = arith.constant 0 : index
    %0 = vector.load %arg1[%c0, %c0_0] : memref<128x32xbf16, #tpu.memory_space<vmem>>, vector<128x32xbf16>
    %c0_1 = arith.constant 0 : index
    %c0_2 = arith.constant 0 : index
    %1 = vector.load %arg2[%c0_1, %c0_2] : memref<32x128xbf16, #tpu.memory_space<vmem>>, vector<32x128xbf16>
    %cst = arith.constant dense<0.000000e+00> : vector<128x128xf32>
    %2 = tpu.matmul %0, %1, %cst {dimension_numbers = #tpu.dot_dimension_numbers<[1], [0], [0], [1], [0, 0, 1, 1], [], []>} : vector<128x32xbf16>, vector<32x128xbf16>, vector<128x128xf32> -> vector<128x128xf32>
    %c0_3 = arith.constant 0 : index
    %c0_4 = arith.constant 0 : index
    %3 = vector.load %arg4[%c0_3, %c0_4] : memref<128x64xbf16, #tpu.memory_space<vmem>>, vector<128x64xbf16>
    %c0_5 = arith.constant 0 : index
    %c0_6 = arith.constant 0 : index
    %4 = vector.load %arg5[%c0_5, %c0_6] : memref<64x128xbf16, #tpu.memory_space<vmem>>, vector<64x128xbf16>
    %cst_7 = arith.constant dense<0.000000e+00> : vector<128x128xf32>
    %5 = tpu.matmul %3, %4, %cst_7 {dimension_numbers = #tpu.dot_dimension_numbers<[1], [0], [0], [1], [0, 0, 1, 1], [], []>} : vector<128x64xbf16>, vector<64x128xbf16>, vector<128x128xf32> -> vector<128x128xf32>
    %6 = arith.addf %2, %5 : vector<128x128xf32>
    %c0_8 = arith.constant 0 : index
    %c0_9 = arith.constant 0 : index
    %7 = vector.load %arg3[%c0_8, %c0_9] : memref<1x128xf32, #tpu.memory_space<vmem>>, vector<1x128xf32>
    %8 = vector.broadcast %7 : vector<1x128xf32> to vector<128x128xf32>
    %9 = arith.addf %6, %8 : vector<128x128xf32>
    %cst_10 = arith.constant 0.000000e+00 : f32
    %10 = vector.broadcast %cst_10 : f32 to vector<128x128xf32>
    %11 = arith.maximumf %9, %10 : vector<128x128xf32>
    %c0_11 = arith.constant 0 : index
    %c0_12 = arith.constant 0 : index
    %12 = vector.load %arg6[%c0_11, %c0_12] : memref<128x128xf32, #tpu.memory_space<vmem>>, vector<128x128xf32>
    tpu.vector_store %arg6[%c0_11, %c0_12], %11 {strides = array<i32>} : memref<128x128xf32, #tpu.memory_space<vmem>>, vector<128x128xf32>,
    return
  }
  func.func @transform_0(%arg0: i32) -> (i32, i32) {
    %c0_i32 = arith.constant 0 : i32
    %c0_i32_0 = arith.constant 0 : i32
    return %arg0, %c0_i32 : i32, i32
  }
  func.func @transform_1(%arg0: i32) -> (i32, i32) {
    %c0_i32 = arith.constant 0 : i32
    %c0_i32_0 = arith.constant 0 : i32
    %c0_i32_1 = arith.constant 0 : i32
    return %c0_i32, %c0_i32_0 : i32, i32
  }
  func.func @transform_2(%arg0: i32) -> (i32, i32) {
    %c0_i32 = arith.constant 0 : i32
    %c0_i32_0 = arith.constant 0 : i32
    %c0_i32_1 = arith.constant 0 : i32
    return %c0_i32, %c0_i32_0 : i32, i32
  }
  func.func @transform_3(%arg0: i32) -> (i32, i32) {
    %c0_i32 = arith.constant 0 : i32
    %c0_i32_0 = arith.constant 0 : i32
    return %arg0, %c0_i32 : i32, i32
  }
  func.func @transform_4(%arg0: i32) -> (i32, i32) {
    %c0_i32 = arith.constant 0 : i32
    %c0_i32_0 = arith.constant 0 : i32
    %c0_i32_1 = arith.constant 0 : i32
    return %c0_i32, %c0_i32_0 : i32, i32
  }
  func.func @transform_5(%arg0: i32) -> (i32, i32) {
    %c0_i32 = arith.constant 0 : i32
    %c0_i32_0 = arith.constant 0 : i32
    return %arg0, %c0_i32 : i32, i32
  }
}

</mosaic_0001>

<bundles_post_ra>
// kernel: bottleneck_forward.3
= control target key start
LH: loop header
LB: loop body
LE: loop exit
PB: predicated region body
PF: predicated region fallthrough
CT: control target
= control target key end

     0   :  { %s790_s12 = smov 0   ;;  %s963_s0 = inlined_call_operand.vmem [shape: bf16[512,64], index: 0, kind: input, shape index: {}]   ;;  %s964_s1 = inlined_call_operand.vmem [shape: bf16[64,32], index: 1, kind: input, shape index: {}]   ;;  %s965_s2 = inlined_call_operand.vmem [shape: f32[1,32], index: 2, kind: input, shape index: {}]   ;;  %s966_s3 = inlined_call_operand.vmem [shape: bf16[512,32], index: 3, kind: output, shape index: {}]  }
   0x1 LB: > { %s614_s13 = sadd.s32 4294967295, %s768_s12   ;;  %p618_p0 = scmp.ge.s32.totalorder %s768_s12, 1  ;;  %s768_s12 = sphi %s790_s12, %s13_s12  }
   0x2   : > { %p138_p1 = scmp.lt.s32.totalorder %s768_s12, 3 }
   0x4   : > { %p139_p2 = pnand %p618_p0, %p138_p1 }
   0x5   : > { %s619_s16 = sshll.u32 (!%p139_p2), %s614_s13, 5 }
   0x6   : > { %142 = sbr.rel (%p139_p2) target bundleno = 224 (0xe0), region = 32  ;;  %p163_p3 = scmp.lt.s32.totalorder (!%p139_p2), %s619_s16, 63 }
   0xb   : > { %v740_v0 = vld [vmem:[%s964_s1 + $0x18] sm:$0xff]  ;;  %v739_v1 = vld [vmem:[%s964_s1 + $0x10] sm:$0xff]  ;;  %s968_s16 = smov (!%p163_p3, %s619_s16), 63  ;;  %v738_v2 = vld [vmem:[%s964_s1 + $0x8] sm:$0xff]  ;;  %vm323_vm0 = vcmask 523264   ;;  %vm525_vm1 = vcmask 257024  }
   0xc   : > { %376 = vmatpush.bf16.msra.mxu0 %v740_v0  ;;  %741 = vmatpush.bf16.msra.mxu1 %v740_v0  ;;  %s620_s21 = sshll.u32 %s968_s16, 2  ;;  %v737_v3 = vld [vmem:[%s964_s1] sm:$0xff] }
   0xd   : > { %742 = vmatpush.bf16.msra.mxu2 %v740_v0  ;;  %743 = vmatpush.bf16.msra.mxu3 %v740_v0  ;;  %s818_s26 = scalar_lea.vmem %s963_s0, %s620_s21  ;;  %v855_v20 = vld [vmem:[%s965_s2] ss:$0 sm:$0xff]  ;;  %s864_s4 = scalar_lea.vmem %s966_s3, %s620_s21 }
   0xe   : > { %v721_v4 = vld [vmem:[%s818_s26] sm:$0xff]  ;;  %v722_v8 = vld [vmem:[%s818_s26 + $0x8] sm:$0xff]  ;;  %v723_v12 = vld [vmem:[%s818_s26 + $0x10] sm:$0xff] }
   0xf   : > { %v725_v5 = vld [vmem:[%s818_s26 + $0x20] sm:$0xff]  ;;  %v726_v9 = vld [vmem:[%s818_s26 + $0x28] sm:$0xff]  ;;  %v727_v13 = vld [vmem:[%s818_s26 + $0x30] sm:$0xff] }
  0x10   : > { %377 = vmatpush.bf16.msra.mxu0 %v739_v1  ;;  %744 = vmatpush.bf16.msra.mxu1 %v739_v1  ;;  %v729_v6 = vld [vmem:[%s818_s26 + $0x40] sm:$0xff]  ;;  %v730_v10 = vld [vmem:[%s818_s26 + $0x48] sm:$0xff]  ;;  %v731_v14 = vld [vmem:[%s818_s26 + $0x50] sm:$0xff] }
  0x11   : > { %745 = vmatpush.bf16.msra.mxu2 %v739_v1  ;;  %746 = vmatpush.bf16.msra.mxu3 %v739_v1  ;;  %v733_v7 = vld [vmem:[%s818_s26 + $0x60] sm:$0xff]  ;;  %v734_v11 = vld [vmem:[%s818_s26 + $0x68] sm:$0xff]  ;;  %v735_v15 = vld [vmem:[%s818_s26 + $0x70] sm:$0xff] }
  0x12   : > { %v724_v16 = vld [vmem:[%s818_s26 + $0x18] sm:$0xff] }
  0x13   : > { %v728_v17 = vld [vmem:[%s818_s26 + $0x38] sm:$0xff] }
  0x14   : > { %378 = vmatpush.bf16.msra.mxu0 %v738_v2  ;;  %747 = vmatpush.bf16.msra.mxu1 %v738_v2  ;;  %v732_v18 = vld [vmem:[%s818_s26 + $0x58] sm:$0xff] }
  0x15   : > { %748 = vmatpush.bf16.msra.mxu2 %v738_v2  ;;  %749 = vmatpush.bf16.msra.mxu3 %v738_v2  ;;  %v736_v19 = vld [vmem:[%s818_s26 + $0x78] sm:$0xff] }
  0x18   : > { %379 = vmatpush.bf16.msra.mxu0 %v737_v3  ;;  %750 = vmatpush.bf16.msra.mxu1 %v737_v3 }
  0x19   : > { %751 = vmatpush.bf16.msra.mxu2 %v737_v3  ;;  %752 = vmatpush.bf16.msra.mxu3 %v737_v3 }
  0x1b   : > { %703 = vmatmul.msk.bf16.vlgmr.msra.gmra.mxu0 %vm323_vm0, %v721_v4  ;;  %707 = vmatmul.msk.bf16.vlgmr.msra.gmra.mxu1 %vm323_vm0, %v725_v5 }
  0x1c   : > { %711 = vmatmul.msk.bf16.vlgmr.msra.gmra.mxu2 %vm323_vm0, %v729_v6  ;;  %715 = vmatmul.msk.bf16.vlgmr.msra.gmra.mxu3 %vm323_vm0, %v733_v7 }
  0x2b   : > { %704 = vmatmul.msk.bf16.gmra.mxu0 %vm323_vm0, %v722_v8  ;;  %708 = vmatmul.msk.bf16.gmra.mxu1 %vm323_vm0, %v726_v9 }
  0x2c   : > { %712 = vmatmul.msk.bf16.gmra.mxu2 %vm323_vm0, %v730_v10  ;;  %716 = vmatmul.msk.bf16.gmra.mxu3 %vm323_vm0, %v734_v11 }
  0x3b   : > { %705 = vmatmul.msk.bf16.gmra.mxu0 %vm323_vm0, %v723_v12  ;;  %709 = vmatmul.msk.bf16.gmra.mxu1 %vm323_vm0, %v727_v13 }
  0x3c   : > { %713 = vmatmul.msk.bf16.gmra.mxu2 %vm323_vm0, %v731_v14  ;;  %717 = vmatmul.msk.bf16.gmra.mxu3 %vm323_vm0, %v735_v15 }
  0x4b   : > { %706 = vmatmul.msk.bf16.gmra.mxu0 %vm323_vm0, %v724_v16  ;;  %710 = vmatmul.msk.bf16.gmra.mxu1 %vm323_vm0, %v728_v17 }
  0x4c   : > { %714 = vmatmul.msk.bf16.gmra.mxu2 %vm323_vm0, %v732_v18  ;;  %718 = vmatmul.msk.bf16.gmra.mxu3 %vm323_vm0, %v736_v19 }
  0x98   : > { %v381_v21 = vpop.f32.mrf.mxu0  ;;  %v401_v22 = vpop.f32.mrf.mxu1 }
  0x99   : > { %v382_v23 = vadd.f32 %v855_v20, %v381_v21  ;;  %v402_v24 = vadd.f32 %v855_v20, %v401_v22 }
  0x9b   : > { %v461_v25 = vmax.f32 %v382_v23, 0.0  ;;  %v469_v26 = vmax.f32 %v402_v24, 0.0 }
  0x9d   : > { %v493_v27 = vpack.c.bf16 %v461_v25, %v461_v25  ;;  %v501_v28 = vpack.c.bf16 %v469_v26, %v469_v26 }
  0x9f   : > { %526 = vst.msk [vmem:[%s864_s4] sm:$0xf] %vm525_vm1, %v493_v27  ;;  %v421_v29 = vpop.f32.mrf.mxu2  ;;  %v441_v30 = vpop.f32.mrf.mxu3 }
  0xa0   : > { %534 = vst.msk [vmem:[%s864_s4 + $0x20] sm:$0xf] %vm525_vm1, %v501_v28  ;;  %v422_v31 = vadd.f32 %v855_v20, %v421_v29  ;;  %v442_v32 = vadd.f32 %v855_v20, %v441_v30  ;;  %v383_v33 = vpop.f32.mrf.mxu0  ;;  %v403_v34 = vpop.f32.mrf.mxu1 }
  0xa1   : > { %v384_v35 = vadd.f32 %v855_v20, %v383_v33  ;;  %v404_v36 = vadd.f32 %v855_v20, %v403_v34 }
  0xa2   : > { %v477_v37 = vmax.f32 %v422_v31, 0.0  ;;  %v485_v38 = vmax.f32 %v442_v32, 0.0 }
  0xa3   : > { %v462_v39 = vmax.f32 %v384_v35, 0.0  ;;  %v470_v40 = vmax.f32 %v404_v36, 0.0 }
  0xa4   : > { %v509_v41 = vpack.c.bf16 %v477_v37, %v477_v37  ;;  %v517_v42 = vpack.c.bf16 %v485_v38, %v485_v38 }
  0xa5   : > { %v494_v43 = vpack.c.bf16 %v462_v39, %v462_v39  ;;  %v502_v44 = vpack.c.bf16 %v470_v40, %v470_v40 }
  0xa6   : > { %542 = vst.msk [vmem:[%s864_s4 + $0x40] sm:$0xf] %vm525_vm1, %v509_v41 }
  0xa7   : > { %550 = vst.msk [vmem:[%s864_s4 + $0x60] sm:$0xf] %vm525_vm1, %v517_v42  ;;  %v423_v45 = vpop.f32.mrf.mxu2  ;;  %v443_v46 = vpop.f32.mrf.mxu3 }
  0xa8   : > { %527 = vst.msk [vmem:[%s864_s4 + $0x4] sm:$0xf] %vm525_vm1, %v494_v43  ;;  %v424_v47 = vadd.f32 %v855_v20, %v423_v45  ;;  %v444_v48 = vadd.f32 %v855_v20, %v443_v46  ;;  %v386_v49 = vpop.f32.mrf.mxu0  ;;  %v406_v50 = vpop.f32.mrf.mxu1 }
  0xa9   : > { %535 = vst.msk [vmem:[%s864_s4 + $0x24] sm:$0xf] %vm525_vm1, %v502_v44  ;;  %v387_v51 = vadd.f32 %v855_v20, %v386_v49  ;;  %v407_v52 = vadd.f32 %v855_v20, %v406_v50 }
  0xaa   : > { %v478_v53 = vmax.f32 %v424_v47, 0.0  ;;  %v486_v54 = vmax.f32 %v444_v48, 0.0 }
  0xab   : > { %v463_v55 = vmax.f32 %v387_v51, 0.0  ;;  %v471_v56 = vmax.f32 %v407_v52, 0.0 }
  0xac   : > { %v510_v57 = vpack.c.bf16 %v478_v53, %v478_v53  ;;  %v518_v58 = vpack.c.bf16 %v486_v54, %v486_v54 }
  0xad   : > { %v495_v59 = vpack.c.bf16 %v463_v55, %v463_v55  ;;  %v503_v60 = vpack.c.bf16 %v471_v56, %v471_v56 }
  0xae   : > { %543 = vst.msk [vmem:[%s864_s4 + $0x44] sm:$0xf] %vm525_vm1, %v510_v57 }
  0xaf   : > { %551 = vst.msk [vmem:[%s864_s4 + $0x64] sm:$0xf] %vm525_vm1, %v518_v58  ;;  %v426_v61 = vpop.f32.mrf.mxu2  ;;  %v446_v62 = vpop.f32.mrf.mxu3 }
  0xb0   : > { %528 = vst.msk [vmem:[%s864_s4 + $0x8] sm:$0xf] %vm525_vm1, %v495_v59  ;;  %v427_v63 = vadd.f32 %v855_v20, %v426_v61  ;;  %v447_v0 = vadd.f32 %v855_v20, %v446_v62  ;;  %v388_v1 = vpop.f32.mrf.mxu0  ;;  %v408_v2 = vpop.f32.mrf.mxu1 }
  0xb1   : > { %536 = vst.msk [vmem:[%s864_s4 + $0x28] sm:$0xf] %vm525_vm1, %v503_v60  ;;  %v389_v3 = vadd.f32 %v855_v20, %v388_v1  ;;  %v409_v4 = vadd.f32 %v855_v20, %v408_v2 }
  0xb2   : > { %v479_v5 = vmax.f32 %v427_v63, 0.0  ;;  %v487_v6 = vmax.f32 %v447_v0, 0.0 }
  0xb3   : > { %v464_v7 = vmax.f32 %v389_v3, 0.0  ;;  %v472_v8 = vmax.f32 %v409_v4, 0.0 }
  0xb4   : > { %v511_v9 = vpack.c.bf16 %v479_v5, %v479_v5  ;;  %v519_v10 = vpack.c.bf16 %v487_v6, %v487_v6 }
  0xb5   : > { %v496_v11 = vpack.c.bf16 %v464_v7, %v464_v7  ;;  %v504_v12 = vpack.c.bf16 %v472_v8, %v472_v8 }
  0xb6   : > { %544 = vst.msk [vmem:[%s864_s4 + $0x48] sm:$0xf] %vm525_vm1, %v511_v9 }
  0xb7   : > { %552 = vst.msk [vmem:[%s864_s4 + $0x68] sm:$0xf] %vm525_vm1, %v519_v10  ;;  %v428_v13 = vpop.f32.mrf.mxu2  ;;  %v448_v14 = vpop.f32.mrf.mxu3 }
  0xb8   : > { %529 = vst.msk [vmem:[%s864_s4 + $0xc] sm:$0xf] %vm525_vm1, %v496_v11  ;;  %v429_v15 = vadd.f32 %v855_v20, %v428_v13  ;;  %v449_v16 = vadd.f32 %v855_v20, %v448_v14  ;;  %v391_v17 = vpop.f32.mrf.mxu0  ;;  %v411_v18 = vpop.f32.mrf.mxu1 }
  0xb9   : > { %537 = vst.msk [vmem:[%s864_s4 + $0x2c] sm:$0xf] %vm525_vm1, %v504_v12  ;;  %v392_v19 = vadd.f32 %v855_v20, %v391_v17  ;;  %v412_v21 = vadd.f32 %v855_v20, %v411_v18 }
  0xba   : > { %v480_v22 = vmax.f32 %v429_v15, 0.0  ;;  %v488_v23 = vmax.f32 %v449_v16, 0.0 }
  0xbb   : > { %v465_v24 = vmax.f32 %v392_v19, 0.0  ;;  %v473_v25 = vmax.f32 %v412_v21, 0.0 }
  0xbc   : > { %v512_v26 = vpack.c.bf16 %v480_v22, %v480_v22  ;;  %v520_v27 = vpack.c.bf16 %v488_v23, %v488_v23 }
  0xbd   : > { %v497_v28 = vpack.c.bf16 %v465_v24, %v465_v24  ;;  %v505_v29 = vpack.c.bf16 %v473_v25, %v473_v25 }
  0xbe   : > { %545 = vst.msk [vmem:[%s864_s4 + $0x4c] sm:$0xf] %vm525_vm1, %v512_v26 }
  0xbf   : > { %553 = vst.msk [vmem:[%s864_s4 + $0x6c] sm:$0xf] %vm525_vm1, %v520_v27  ;;  %v431_v30 = vpop.f32.mrf.mxu2  ;;  %v451_v31 = vpop.f32.mrf.mxu3 }
  0xc0   : > { %530 = vst.msk [vmem:[%s864_s4 + $0x10] sm:$0xf] %vm525_vm1, %v497_v28  ;;  %v432_v32 = vadd.f32 %v855_v20, %v431_v30  ;;  %v452_v33 = vadd.f32 %v855_v20, %v451_v31  ;;  %v393_v34 = vpop.f32.mrf.mxu0  ;;  %v413_v35 = vpop.f32.mrf.mxu1 }
  0xc1   : > { %538 = vst.msk [vmem:[%s864_s4 + $0x30] sm:$0xf] %vm525_vm1, %v505_v29  ;;  %v394_v36 = vadd.f32 %v855_v20, %v393_v34  ;;  %v414_v37 = vadd.f32 %v855_v20, %v413_v35 }
  0xc2   : > { %v481_v38 = vmax.f32 %v432_v32, 0.0  ;;  %v489_v39 = vmax.f32 %v452_v33, 0.0 }
  0xc3   : > { %v466_v40 = vmax.f32 %v394_v36, 0.0  ;;  %v474_v41 = vmax.f32 %v414_v37, 0.0 }
  0xc4   : > { %v513_v42 = vpack.c.bf16 %v481_v38, %v481_v38  ;;  %v521_v43 = vpack.c.bf16 %v489_v39, %v489_v39 }
  0xc5   : > { %v498_v44 = vpack.c.bf16 %v466_v40, %v466_v40  ;;  %v506_v45 = vpack.c.bf16 %v474_v41, %v474_v41 }
  0xc6   : > { %546 = vst.msk [vmem:[%s864_s4 + $0x50] sm:$0xf] %vm525_vm1, %v513_v42 }
  0xc7   : > { %554 = vst.msk [vmem:[%s864_s4 + $0x70] sm:$0xf] %vm525_vm1, %v521_v43  ;;  %v433_v46 = vpop.f32.mrf.mxu2  ;;  %v453_v47 = vpop.f32.mrf.mxu3 }
  0xc8   : > { %531 = vst.msk [vmem:[%s864_s4 + $0x14] sm:$0xf] %vm525_vm1, %v498_v44  ;;  %v434_v48 = vadd.f32 %v855_v20, %v433_v46  ;;  %v454_v49 = vadd.f32 %v855_v20, %v453_v47  ;;  %v396_v50 = vpop.f32.mrf.mxu0  ;;  %v416_v51 = vpop.f32.mrf.mxu1 }
  0xc9   : > { %539 = vst.msk [vmem:[%s864_s4 + $0x34] sm:$0xf] %vm525_vm1, %v506_v45  ;;  %v397_v52 = vadd.f32 %v855_v20, %v396_v50  ;;  %v417_v53 = vadd.f32 %v855_v20, %v416_v51 }
  0xca   : > { %v482_v54 = vmax.f32 %v434_v48, 0.0  ;;  %v490_v55 = vmax.f32 %v454_v49, 0.0 }
  0xcb   : > { %v467_v56 = vmax.f32 %v397_v52, 0.0  ;;  %v475_v57 = vmax.f32 %v417_v53, 0.0 }
  0xcc   : > { %v514_v58 = vpack.c.bf16 %v482_v54, %v482_v54  ;;  %v522_v59 = vpack.c.bf16 %v490_v55, %v490_v55 }
  0xcd   : > { %v499_v60 = vpack.c.bf16 %v467_v56, %v467_v56  ;;  %v507_v61 = vpack.c.bf16 %v475_v57, %v475_v57 }
  0xce   : > { %547 = vst.msk [vmem:[%s864_s4 + $0x54] sm:$0xf] %vm525_vm1, %v514_v58 }
  0xcf   : > { %555 = vst.msk [vmem:[%s864_s4 + $0x74] sm:$0xf] %vm525_vm1, %v522_v59  ;;  %v436_v62 = vpop.f32.mrf.mxu2  ;;  %v456_v63 = vpop.f32.mrf.mxu3 }
  0xd0   : > { %532 = vst.msk [vmem:[%s864_s4 + $0x18] sm:$0xf] %vm525_vm1, %v499_v60  ;;  %v437_v0 = vadd.f32 %v855_v20, %v436_v62  ;;  %v457_v1 = vadd.f32 %v855_v20, %v456_v63  ;;  %v398_v2 = vpop.f32.mrf.mxu0  ;;  %v418_v3 = vpop.f32.mrf.mxu1 }
  0xd1   : > { %540 = vst.msk [vmem:[%s864_s4 + $0x38] sm:$0xf] %vm525_vm1, %v507_v61  ;;  %v399_v4 = vadd.f32 %v855_v20, %v398_v2  ;;  %v419_v5 = vadd.f32 %v855_v20, %v418_v3 }
  0xd2   : > { %v483_v6 = vmax.f32 %v437_v0, 0.0  ;;  %v491_v7 = vmax.f32 %v457_v1, 0.0 }
  0xd3   : > { %v468_v8 = vmax.f32 %v399_v4, 0.0  ;;  %v476_v9 = vmax.f32 %v419_v5, 0.0 }
  0xd4   : > { %v515_v10 = vpack.c.bf16 %v483_v6, %v483_v6  ;;  %v523_v11 = vpack.c.bf16 %v491_v7, %v491_v7 }
  0xd5   : > { %v500_v12 = vpack.c.bf16 %v468_v8, %v468_v8  ;;  %v508_v13 = vpack.c.bf16 %v476_v9, %v476_v9 }
  0xd6   : > { %548 = vst.msk [vmem:[%s864_s4 + $0x58] sm:$0xf] %vm525_vm1, %v515_v10 }
  0xd7   : > { %556 = vst.msk [vmem:[%s864_s4 + $0x78] sm:$0xf] %vm525_vm1, %v523_v11  ;;  %v438_v14 = vpop.f32.mrf.mxu2  ;;  %v458_v15 = vpop.f32.mrf.mxu3 }
  0xd8   : > { %533 = vst.msk [vmem:[%s864_s4 + $0x1c] sm:$0xf] %vm525_vm1, %v500_v12  ;;  %v439_v16 = vadd.f32 %v855_v20, %v438_v14  ;;  %v459_v17 = vadd.f32 %v855_v20, %v458_v15 }
  0xd9   : > { %541 = vst.msk [vmem:[%s864_s4 + $0x3c] sm:$0xf] %vm525_vm1, %v508_v13 }
  0xda   : > { %v484_v18 = vmax.f32 %v439_v16, 0.0  ;;  %v492_v19 = vmax.f32 %v459_v17, 0.0 }
  0xdc   : > { %v516_v21 = vpack.c.bf16 %v484_v18, %v484_v18  ;;  %v524_v22 = vpack.c.bf16 %v492_v19, %v492_v19 }
  0xde   : > { %549 = vst.msk [vmem:[%s864_s4 + $0x5c] sm:$0xf] %vm525_vm1, %v516_v21 }
  0xdf   : > { %557 = vst.msk [vmem:[%s864_s4 + $0x7c] sm:$0xf] %vm525_vm1, %v524_v22 }
  0xe0 PF: > { %s13_s12 = sadd.s32 1, %s768_s12  }
  0xe1   : > { %p10_p4 = scmp.ge.s32.totalorder %s13_s12, 4  }
  0xe3   :  { %12 = sbr.rel (!%p10_p4) target bundleno = 1 (0x1), region = 62 }

// kernel: bottleneck_forward.4
= control target key start
LH: loop header
LB: loop body
LE: loop exit
PB: predicated region body
PF: predicated region fallthrough
CT: control target
= control target key end

     0   :  { %s908_s12 = smov 0   ;;  %s1189_s0 = inlined_call_operand.vmem [shape: bf16[2,18,18,32], index: 0, kind: input, shape index: {}]   ;;  %s1190_s1 = inlined_call_operand.vmem [shape: bf16[9,32,32], index: 1, kind: input, shape index: {}]   ;;  %s1191_s2 = inlined_call_operand.vmem [shape: f32[1,32], index: 2, kind: input, shape index: {}]   ;;  %s1192_s3 = inlined_call_operand.vmem [shape: bf16[2,8,8,32], index: 3, kind: output, shape index: {}]  }
   0x1 LB: > { %s664_s13 = sadd.s32 4294967295, %s882_s12   ;;  %p668_p0 = scmp.ge.s32.totalorder %s882_s12, 1  ;;  %s882_s12 = sphi %s908_s12, %s13_s12  }
   0x2   : > { %p137_p1 = scmp.lt.s32.totalorder %s882_s12, 3 }
   0x4   : > { %p138_p2 = pnand %p668_p0, %p137_p1 }
   0x5   : > { %p161_p3 = scmp.lt.s32.totalorder (!%p138_p2), %s664_s13, 1  ;;  %s1111_s21 = smov (!%p138_p2), 0  }
   0x6   : > { %141 = sbr.rel (%p138_p2) target bundleno = 204 (0xcc), region = 32 }
   0xb   : > { %v919_v0 = vld [vmem:[%s1191_s2] sm:$0x1]  ;;  %v929_v2 = vld [vmem:[%s1190_s1] sm:$0xf0]  ;;  %v934_v3 = vld [vmem:[%s1190_s1 + $0x8] sm:$0xf] }
   0xc   : > { %v924_v1 = vld [vmem:[%s1190_s1] sm:$0xf]  ;;  %v939_v4 = vld [vmem:[%s1190_s1 + $0x8] sm:$0xf0]  ;;  %s1194_s13 = smov (!%p161_p3, %s664_s13), 1 }
   0xd   : > { %v944_v5 = vld [vmem:[%s1190_s1 + $0x10] sm:$0xf]  ;;  %v949_v6 = vld [vmem:[%s1190_s1 + $0x10] sm:$0xf0]  ;;  %v954_v7 = vld [vmem:[%s1190_s1 + $0x18] sm:$0xf] }
   0xe   : > { %v959_v8 = vld [vmem:[%s1190_s1 + $0x18] sm:$0xf0]  ;;  %v964_v9 = vld [vmem:[%s1190_s1 + $0x20] sm:$0xf]  ;;  %s855_s7 = smul.u32 216, %s1194_s13  ;;  %s829_s8 = sshll.u32 %s1194_s13, 5 }
   0xf   : > { %v969_v10 = vld [vmem:[%s1190_s1 + $0x20] sm:$0xf0]  ;;  %v974_v11 = vld [vmem:[%s1190_s1 + $0x28] sm:$0xf]  ;;  %s979_s17 = scalar_lea.vmem %s1192_s3, %s829_s8  ;;  %v984_v12 = vld [vmem:[%s1190_s1 + $0x28] sm:$0xf0] }
  0x10   : > { %v989_v13 = vld [vmem:[%s1190_s1 + $0x30] sm:$0xf]  ;;  %v994_v14 = vld [vmem:[%s1190_s1 + $0x30] sm:$0xf0]  ;;  %s999_s25 = scalar_lea.vmem %s1189_s0, %s855_s7  ;;  %v1004_v15 = vld [vmem:[%s1190_s1 + $0x38] sm:$0xf] }
  0x11   : > { %v1009_v16 = vld [vmem:[%s1190_s1 + $0x38] sm:$0xf0]  ;;  %v1014_v17 = vld [vmem:[%s1190_s1 + $0x40] sm:$0xf]  ;;  %v1019_v18 = vld [vmem:[%s1190_s1 + $0x40] sm:$0xf0] }
  0x12   : > { %v1024_v19 = vld [vmem:[%s1190_s1 + $0x48] sm:$0xf]  ;;  %v1029_v20 = vld [vmem:[%s1190_s1 + $0x48] sm:$0xf0]  ;;  %v1034_v21 = vld [vmem:[%s1190_s1 + $0x50] sm:$0xf] }
  0x13   : > { %v1039_v22 = vld [vmem:[%s1190_s1 + $0x50] sm:$0xf0]  ;;  %v1044_v23 = vld [vmem:[%s1190_s1 + $0x58] sm:$0xf]  ;;  %v1049_v24 = vld [vmem:[%s1190_s1 + $0x58] sm:$0xf0] }
  0x14   : > { %v1054_v25 = vld [vmem:[%s1190_s1 + $0x60] sm:$0xf]  ;;  %v1059_v26 = vld [vmem:[%s1190_s1 + $0x60] sm:$0xf0]  ;;  %v1064_v27 = vld [vmem:[%s1190_s1 + $0x68] sm:$0xf] }
  0x15   : > { %v1069_v28 = vld [vmem:[%s1190_s1 + $0x68] sm:$0xf0]  ;;  %v1074_v29 = vld [vmem:[%s1190_s1 + $0x70] sm:$0xf]  ;;  %v1079_v30 = vld [vmem:[%s1190_s1 + $0x70] sm:$0xf0] }
  0x16   : > { %v1084_v31 = vld [vmem:[%s1190_s1 + $0x78] sm:$0xf]  ;;  %v1089_v32 = vld [vmem:[%s1190_s1 + $0x78] sm:$0xf0]  ;;  %v1094_v33 = vld [vmem:[%s1190_s1 + $0x80] sm:$0xf] }
  0x17   : > { %v1099_v34 = vld [vmem:[%s1190_s1 + $0x80] sm:$0xf0]  ;;  %v1104_v35 = vld [vmem:[%s1190_s1 + $0x88] sm:$0xf]  ;;  %v1109_v36 = vld [vmem:[%s1190_s1 + $0x88] sm:$0xf0] }
  0x18 LB: >> { %v718_v37 = vor.u32 %v959_v8, %v954_v7  ;;  %v727_v38 = vor.u32 %v939_v4, %v934_v3  ;;  %v740_v39 = vor.u32 %v984_v12, %v974_v11  ;;  %v752_v40 = vor.u32 %v1009_v16, %v1004_v15  ;;  %s848_s22 = smul.u32 24, %s886_s21  ;;  %s826_s24 = sshll.u32 %s886_s21, 2  ;;  %s886_s21 = sphi %s1111_s21, %s222_s21  }
  0x19   : >> { %v714_v41 = vor.u32 %v949_v6, %v944_v5  ;;  %v723_v42 = vor.u32 %v929_v2, %v924_v1  ;;  %v736_v43 = vor.u32 %v969_v10, %v964_v9  ;;  %v748_v44 = vor.u32 %v994_v14, %v989_v13  ;;  %s589_s26 = scalar_lea.vmem %s979_s17, %s826_s24  ;;  %s222_s21 = sadd.s32 1, %s886_s21  }
  0x1a   : >> { %264 = vmatpush.bf16.msra.mxu0 %v718_v37  ;;  %292 = vmatpush.bf16.msra.mxu1 %v727_v38  ;;  %s1134_s23 = scalar_lea.vmem %s999_s25, %s848_s22  ;;  %v767_v45 = vor.u32 %v1029_v20, %v1024_v19  ;;  %v794_v46 = vor.u32 %v1069_v28, %v1064_v27  ;;  %vm254_vm0 = vcmask 261120   ;;  %v809_v49 = vor.u32 %v1089_v32, %v1084_v31  ;;  %p219_p4 = scmp.ge.s32.totalorder %s222_s21, 8  }
  0x1b   : >> { %334 = vmatpush.bf16.msra.mxu2 %v740_v39  ;;  %368 = vmatpush.bf16.msra.mxu3 %v752_v40  ;;  %v709_v47 = vld [vmem:[%s1134_s23 + $0x4] sm:$0xf]  ;;  %v849_v48 = vld [vmem:[%s1134_s23 + $0x4] sm:$0x10]  ;;  %v227_v51 = vld [vmem:[%s1134_s23] sm:$0xf]  ;;  %v782_v54 = vor.u32 %v1049_v24, %v1044_v23  ;;  %v763_v59 = vor.u32 %v1019_v18, %v1014_v17  ;;  %v790_v60 = vor.u32 %v1059_v26, %v1054_v25 }
  0x1c   : >> { %v710_v50 = vor.u32 %v849_v48, %v709_v47  ;;  %v731_v52 = vld [vmem:[%s1134_s23] sm:$0xf]  ;;  %v850_v53 = vld [vmem:[%s1134_s23] sm:$0x10]  ;;  %v744_v56 = vld [vmem:[%s1134_s23 + $0xc] sm:$0xf]  ;;  %v805_v38 = vor.u32 %v1079_v30, %v1074_v29  ;;  %v824_v48 = vor.u32 %v1109_v36, %v1104_v35 }
  0x1d   : >> { %v732_v55 = vor.u32 %v850_v53, %v731_v52  ;;  %v800_v61 = vld [vmem:[%s1134_s23 + $0x1c] sm:$0xf]  ;;  %v853_v62 = vld [vmem:[%s1134_s23 + $0x1c] sm:$0x10]  ;;  %v773_v39 = vld [vmem:[%s1134_s23 + $0xc] sm:$0xf] }
  0x1e   : >> { %265 = vmatpush.bf16.msra.mxu0 %v714_v41  ;;  %293 = vmatpush.bf16.msra.mxu1 %v723_v42  ;;  %v236_v57 = vshrl.u32 %v710_v50, 16  ;;  %v238_v58 = vshll.u32 %v710_v50, 16  ;;  %v852_v40 = vld [vmem:[%s1134_s23 + $0xc] sm:$0x10]  ;;  %v778_v42 = vor.u32 %v1039_v22, %v1034_v21  ;;  %v851_v47 = vld [vmem:[%s1134_s23 + $0x10] sm:$0x10] }
  0x1f   : >> { %335 = vmatpush.bf16.msra.mxu2 %v736_v43  ;;  %369 = vmatpush.bf16.msra.mxu3 %v748_v44  ;;  %v307_v63 = vshrl.u32 %v732_v55, 16  ;;  %v309_v37 = vshll.u32 %v732_v55, 16  ;;  %v801_v43 = vor.u32 %v853_v62, %v800_v61  ;;  %v774_v44 = vor.u32 %v852_v40, %v773_v39  ;;  %v854_v39 = vld [vmem:[%s1134_s23 + $0x18] sm:$0x10]  ;;  %v786_v40 = vld [vmem:[%s1134_s23 + $0x18] sm:$0xf] }
  0x20   : >> { %v240_v41 = vrot.slane %v238_v58, 1  ;;  %vm590_vm1 = vcmask 257024  }
  0x21   : >> { %728 = vmatmul.msk.bf16.vlgmr.msra.gmra.mxu1 %vm254_vm0, %v227_v51  ;;  %v429_v51 = vshll.u32 %v774_v44, 16  ;;  %v506_v53 = vshll.u32 %v801_v43, 16  ;;  %v427_v55 = vshrl.u32 %v774_v44, 16  ;;  %v504_v58 = vshrl.u32 %v801_v43, 16 }
  0x22   : >> { %411 = vmatpush.bf16.msrb.mxu0 %v767_v45  ;;  %753 = vmatmul.msk.bf16.vlgmr.msra.gmra.mxu3 %vm254_vm0, %v744_v56  ;;  %v311_v45 = vrot.slane %v309_v37, 1 }
  0x23   : >> { %488 = vmatpush.bf16.msrb.mxu2 %v794_v46  ;;  %531 = vmatpush.bf16.msrb.mxu3 %v809_v49  ;;  %v758_v46 = vld [vmem:[%s1134_s23 + $0x10] sm:$0xf]  ;;  %v241_v49 = vor.u32 %v240_v41, %v236_v57  ;;  %v431_v56 = vrot.slane %v429_v51, 1 }
  0x24   : >> { %454 = vmatpush.bf16.msrb.mxu1 %v782_v54  ;;  %v312_v50 = vor.u32 %v311_v45, %v307_v63  ;;  %v759_v52 = vor.u32 %v851_v47, %v758_v46  ;;  %v820_v54 = vor.u32 %v1099_v34, %v1094_v33 }
  0x25   : >> { %719 = vmatmul.msk.bf16.vlgmr.msra.gmra.mxu0 %vm254_vm0, %v241_v49 }
  0x26   : >> { %412 = vmatpush.bf16.msrb.mxu0 %v763_v59  ;;  %741 = vmatmul.msk.bf16.vlgmr.msra.gmra.mxu2 %vm254_vm0, %v312_v50  ;;  %v386_v57 = vshll.u32 %v759_v52, 16  ;;  %v508_v59 = vrot.slane %v506_v53, 1  ;;  %v384_v61 = vshrl.u32 %v759_v52, 16 }
  0x27   : >> { %489 = vmatpush.bf16.msrb.mxu2 %v790_v60  ;;  %532 = vmatpush.bf16.msrb.mxu3 %v805_v38  ;;  %v432_v60 = vor.u32 %v431_v56, %v427_v55  ;;  %v815_v38 = vld [vmem:[%s1134_s23 + $0x18] sm:$0xf] }
  0x28   : >> { %455 = vmatpush.bf16.msrb.mxu1 %v778_v42  ;;  %v388_v62 = vrot.slane %v386_v57, 1  ;;  %v509_v63 = vor.u32 %v508_v59, %v504_v58  ;;  %v816_v41 = vor.u32 %v854_v39, %v815_v38 }
  0x2a   : >> { %574 = vmatpush.bf16.msra.mxu0 %v824_v48  ;;  %v389_v37 = vor.u32 %v388_v62, %v384_v61  ;;  %v549_v42 = vshll.u32 %v816_v41, 16  ;;  %v547_v43 = vshrl.u32 %v816_v41, 16 }
  0x2c   : >> { %v551_v44 = vrot.slane %v549_v42, 1  ;;  %v583_v42 = vperm.slane %v919_v0, 0 }
  0x2e   : >> { %575 = vmatpush.bf16.msra.mxu0 %v820_v54  ;;  %v552_v45 = vor.u32 %v551_v44, %v547_v43 }
  0x31   : >> { %783 = vmatmul.msk.bf16.vlgmr.msrb.gmra.mxu1 %vm254_vm0, %v432_v60 }
  0x32   : >> { %810 = vmatmul.msk.bf16.vlgmr.msrb.gmra.mxu3 %vm254_vm0, %v509_v63 }
  0x35   : >> { %768 = vmatmul.msk.bf16.vlgmr.msrb.gmra.mxu0 %vm254_vm0, %v389_v37 }
  0x36   : >> { %795 = vmatmul.msk.bf16.vlgmr.msrb.gmra.mxu2 %vm254_vm0, %v786_v40 }
  0x45   : >> { %825 = vmatmul.msk.bf16.vlgmr.msra.gmra.mxu0 %vm254_vm0, %v552_v45 }
  0x9e   : >> { %v295_v46 = vpop.f32.mrf.mxu1 }
  0xa2   : >> { %v267_v47 = vpop.f32.mrf.mxu0 }
  0xa3   : >> { %v296_v54 = vadd.f32 %v295_v46, %v267_v47 }
  0xa5   : >> { %v371_v48 = vpop.f32.mrf.mxu3 }
  0xa6   : >> { %v297_v49 = vpop.f32.mrf.mxu1 }
  0xa9   : >> { %v337_v50 = vpop.f32.mrf.mxu2 }
  0xaa   : >> { %v269_v51 = vpop.f32.mrf.mxu0  ;;  %v341_v55 = vadd.f32 %v337_v50, %v296_v54 }
  0xac   : >> { %v375_v59 = vadd.f32 %v371_v48, %v341_v55 }
  0xad   : >> { %v373_v52 = vpop.f32.mrf.mxu3 }
  0xae   : >> { %v457_v53 = vpop.f32.mrf.mxu1 }
  0xb1   : >> { %v339_v56 = vpop.f32.mrf.mxu2 }
  0xb2   : >> { %v414_v57 = vpop.f32.mrf.mxu0 }
  0xb3   : >> { %v418_v61 = vadd.f32 %v414_v57, %v375_v59 }
  0xb5   : >> { %v534_v58 = vpop.f32.mrf.mxu3  ;;  %v461_v37 = vadd.f32 %v457_v53, %v418_v61 }
  0xb6   : >> { %v459_v60 = vpop.f32.mrf.mxu1 }
  0xb9   : >> { %v491_v62 = vpop.f32.mrf.mxu2 }
  0xba   : >> { %v416_v63 = vpop.f32.mrf.mxu0  ;;  %v495_v39 = vadd.f32 %v491_v62, %v461_v37 }
  0xbc   : >> { %v538_v40 = vadd.f32 %v534_v58, %v495_v39 }
  0xbd   : >> { %v536_v38 = vpop.f32.mrf.mxu3 }
  0xc1   : >> { %v493_v41 = vpop.f32.mrf.mxu2 }
  0xc2   : >> { %v577_v43 = vpop.f32.mrf.mxu0 }
  0xc3   : >> { %v581_v44 = vadd.f32 %v577_v43, %v538_v40 }
  0xc5   : >> { %v585_v45 = vadd.f32 %v583_v42, %v581_v44 }
  0xc7   : >> { %v586_v46 = vmax.f32 %v585_v45, 0.0  ;;  %221 = sbr.rel (!%p219_p4) target bundleno = 24 (0x18), region = 81 }
  0xc9   : >> { %v587_v47 = vpack.c.bf16 %v586_v46, %v586_v46 }
  0xca   : >> { %v579_v48 = vpop.f32.mrf.mxu0 }
  0xcb   : >> { %591 = vst.msk [vmem:[%s589_s26] sm:$0xf] %vm590_vm1, %v587_v47 }
  0xcc PF: > { %s13_s12 = sadd.s32 1, %s882_s12  }
  0xcd   : > { %p10_p5 = scmp.ge.s32.totalorder %s13_s12, 4  }
  0xcf   :  { %12 = sbr.rel (!%p10_p5) target bundleno = 1 (0x1), region = 92 }

// kernel: bottleneck_forward.5
= control target key start
LH: loop header
LB: loop body
LE: loop exit
PB: predicated region body
PF: predicated region fallthrough
CT: control target
= control target key end

     0   :  { %s707_s0 = inlined_call_operand.vmem [shape: bf16[128,32], index: 0, kind: input, shape index: {}]   ;;  %s708_s1 = inlined_call_operand.vmem [shape: bf16[32,128], index: 1, kind: input, shape index: {}]   ;;  %s709_s2 = inlined_call_operand.vmem [shape: f32[1,128], index: 2, kind: input, shape index: {}]   ;;  %s710_s3 = inlined_call_operand.vmem [shape: bf16[128,64], index: 3, kind: input, shape index: {}]   ;;  %s711_s4 = inlined_call_operand.vmem [shape: bf16[64,128], index: 4, kind: input, shape index: {}]   ;;  %s712_s5 = inlined_call_operand.hbm [shape: f32[128,128], index: 5, kind: output, shape index: {}]  }
   0x1   :  { %v525_v0 = vld [vmem:[%s711_s4 + $0x18] sm:$0xff]  ;;  %v513_v1 = vld [vmem:[%s708_s1 + $0x8] sm:$0xff]  ;;  %v524_v2 = vld [vmem:[%s711_s4 + $0x10] sm:$0xff] }
   0x2   :  { %159 = vmatpush.bf16.msra.mxu0 %v525_v0  ;;  %526 = vmatpush.bf16.msra.mxu2 %v525_v0  ;;  %v512_v3 = vld [vmem:[%s708_s1] sm:$0xff] }
   0x3   :  { %287 = vmatpush.bf16.msra.mxu1 %v513_v1  ;;  %530 = vmatpush.bf16.msra.mxu3 %v513_v1 }
   0x4   :  { %10 = vsyncpa [#allocation3], 0  ;;  %v504_v4 = vld [vmem:[%s707_s0] sm:$0xff]  ;;  %v523_v5 = vld [vmem:[%s711_s4 + $0x8] sm:$0xff]  ;;  %vm256_vm0 = vcmask 261120   ;;  %vm130_vm1 = vcmask 523264  }
   0x5   :  { %v509_v6 = vld [vmem:[%s707_s0 + $0x28] sm:$0xff]  ;;  %v522_v7 = vld [vmem:[%s711_s4] sm:$0xff]  ;;  %v510_v11 = vld [vmem:[%s707_s0 + $0x30] sm:$0xff]  ;;  %s388_s12 = sshll.u32 %s712_s5, 4  ;;  %s563_s4 = smov 128   ;;  %s389_s12 = int_to_ptr.hbm [resolvable:$true] %s388_s12 }
   0x6   :  { %160 = vmatpush.bf16.msra.mxu0 %v524_v2  ;;  %527 = vmatpush.bf16.msra.mxu2 %v524_v2  ;;  %v514_v8 = vld [vmem:[%s710_s3] sm:$0xff]  ;;  %v505_v10 = vld [vmem:[%s707_s0 + $0x8] sm:$0xff]  ;;  %v506_v14 = vld [vmem:[%s707_s0 + $0x10] sm:$0xff]  ;;  %s564_s13 = smov 8  }
   0x7   :  { %288 = vmatpush.bf16.msra.mxu1 %v512_v3  ;;  %531 = vmatpush.bf16.msra.mxu3 %v512_v3  ;;  %v518_v9 = vld [vmem:[%s710_s3 + $0x20] sm:$0xff]  ;;  %v515_v12 = vld [vmem:[%s710_s3 + $0x8] sm:$0xff]  ;;  %v511_v15 = vld [vmem:[%s707_s0 + $0x38] sm:$0xff] }
   0x8   :  { %v519_v13 = vld [vmem:[%s710_s3 + $0x28] sm:$0xff]  ;;  %v516_v16 = vld [vmem:[%s710_s3 + $0x10] sm:$0xff]  ;;  %v507_v18 = vld [vmem:[%s707_s0 + $0x18] sm:$0xff] }
   0x9   :  { %v520_v17 = vld [vmem:[%s710_s3 + $0x30] sm:$0xff]  ;;  %v517_v19 = vld [vmem:[%s710_s3 + $0x18] sm:$0xff]  ;;  %v508_v21 = vld [vmem:[%s707_s0 + $0x20] sm:$0xff]  ;;  %s562_s0 = smov [#allocation2]  }
   0xa   :  { %496 = vmatmul.msk.bf16.vlgmr.msra.gmra.mxu1 %vm256_vm0, %v504_v4  ;;  %161 = vmatpush.bf16.msra.mxu0 %v523_v5  ;;  %v521_v20 = vld [vmem:[%s710_s3 + $0x38] sm:$0xff]  ;;  %v680_v23 = vld [vmem:[%s709_s2] ss:$0 sm:$0xff]  ;;  %s386_s2 = sshll.u32 %s562_s0, 4  ;;  %s387_s2 = int_to_ptr.vmem [resolvable:$true] %s386_s2 }
   0xb   :  { %528 = vmatpush.bf16.msra.mxu2 %v523_v5  ;;  %501 = vmatmul.msk.bf16.vlgmr.msra.gmra.mxu3 %vm256_vm0, %v509_v6 }
   0xe   :  { %162 = vmatpush.bf16.msra.mxu0 %v522_v7 }
   0xf   :  { %529 = vmatpush.bf16.msra.mxu2 %v522_v7 }
  0x11   :  { %448 = vmatmul.msk.bf16.vlgmr.msra.gmra.mxu0 %vm130_vm1, %v514_v8 }
  0x12   :  { %452 = vmatmul.msk.bf16.vlgmr.msra.gmra.mxu2 %vm130_vm1, %v518_v9 }
  0x1a   :  { %497 = vmatmul.msk.bf16.gmra.mxu1 %vm256_vm0, %v505_v10 }
  0x1b   :  { %502 = vmatmul.msk.bf16.gmra.mxu3 %vm256_vm0, %v510_v11 }
  0x21   :  { %449 = vmatmul.msk.bf16.gmra.mxu0 %vm130_vm1, %v515_v12 }
  0x22   :  { %453 = vmatmul.msk.bf16.gmra.mxu2 %vm130_vm1, %v519_v13 }
  0x2a   :  { %498 = vmatmul.msk.bf16.gmra.mxu1 %vm256_vm0, %v506_v14 }
  0x2b   :  { %503 = vmatmul.msk.bf16.gmra.mxu3 %vm256_vm0, %v511_v15 }
  0x31   :  { %450 = vmatmul.msk.bf16.gmra.mxu0 %vm130_vm1, %v516_v16 }
  0x32   :  { %454 = vmatmul.msk.bf16.gmra.mxu2 %vm130_vm1, %v520_v17 }
  0x3a   :  { %499 = vmatmul.msk.bf16.gmra.mxu1 %vm256_vm0, %v507_v18 }
  0x41   :  { %451 = vmatmul.msk.bf16.gmra.mxu0 %vm130_vm1, %v517_v19 }
  0x42   :  { %455 = vmatmul.msk.bf16.gmra.mxu2 %vm130_vm1, %v521_v20 }
  0x4a   :  { %500 = vmatmul.msk.bf16.gmra.mxu1 %vm256_vm0, %v508_v21 }
  0x87   :  { %v290_v22 = vpop.f32.mrf.mxu1 }
  0x8e   :  { %v164_v24 = vpop.f32.mrf.mxu0  ;;  %v315_v35 = vpop.f32.mrf.mxu3 }
  0x8f   :  { %v291_v25 = vadd.f32 %v290_v22, %v164_v24  ;;  %v292_v26 = vpop.f32.mrf.mxu1 }
  0x91   :  { %v334_v27 = vadd.f32 %v680_v23, %v291_v25 }
  0x93   :  { %v350_v28 = vmax.f32 %v334_v27, 0.0 }
  0x95   :  { %366 = vst [vmem:[#allocation2] sm:$0xff] %v350_v28  ;;  %v683_v29 = vpop.f32.mrf.mxu2 }
  0x96   :  { %v166_v30 = vpop.f32.mrf.mxu0  ;;  %v317_v43 = vpop.f32.mrf.mxu3 }
  0x97   :  { %v293_v31 = vadd.f32 %v292_v26, %v166_v30  ;;  %v295_v32 = vpop.f32.mrf.mxu1 }
  0x99   :  { %v335_v33 = vadd.f32 %v680_v23, %v293_v31 }
  0x9b   :  { %v351_v34 = vmax.f32 %v335_v33, 0.0 }
  0x9d   :  { %367 = vst [vmem:[#allocation2 + $0x8] sm:$0xff] %v351_v34  ;;  %v686_v36 = vpop.f32.mrf.mxu2 }
  0x9e   :  { %v169_v37 = vpop.f32.mrf.mxu0  ;;  %v320_v57 = vpop.f32.mrf.mxu3 }
  0x9f   :  { %v296_v38 = vadd.f32 %v295_v32, %v169_v37  ;;  %v297_v39 = vpop.f32.mrf.mxu1 }
  0xa1   :  { %v336_v40 = vadd.f32 %v680_v23, %v296_v38 }
  0xa3   :  { %v352_v41 = vmax.f32 %v336_v40, 0.0 }
  0xa5   :  { %368 = vst [vmem:[#allocation2 + $0x10] sm:$0xff] %v352_v41  ;;  %v189_v42 = vpop.f32.mrf.mxu2 }
  0xa6   :  { %v316_v44 = vadd.f32 %v315_v35, %v189_v42  ;;  %v171_v45 = vpop.f32.mrf.mxu0  ;;  %v322_v5 = vpop.f32.mrf.mxu3 }
  0xa7   :  { %v298_v46 = vadd.f32 %v297_v39, %v171_v45  ;;  %v300_v47 = vpop.f32.mrf.mxu1 }
  0xa8   :  { %v344_v48 = vadd.f32 %v680_v23, %v316_v44 }
  0xa9   :  { %v337_v49 = vadd.f32 %v680_v23, %v298_v46 }
  0xaa   :  { %v360_v50 = vmax.f32 %v344_v48, 0.0 }
  0xab   :  { %v353_v51 = vmax.f32 %v337_v49, 0.0 }
  0xac   :  { %376 = vst [vmem:[#allocation2 + $0x50] sm:$0xff] %v360_v50 }
  0xad   :  { %369 = vst [vmem:[#allocation2 + $0x18] sm:$0xff] %v353_v51  ;;  %v191_v52 = vpop.f32.mrf.mxu2 }
  0xae   :  { %v318_v53 = vadd.f32 %v317_v43, %v191_v52  ;;  %v174_v54 = vpop.f32.mrf.mxu0  ;;  %v325_v17 = vpop.f32.mrf.mxu3 }
  0xaf   :  { %v301_v55 = vadd.f32 %v300_v47, %v174_v54  ;;  %v302_v56 = vpop.f32.mrf.mxu1 }
  0xb0   :  { %v345_v58 = vadd.f32 %v680_v23, %v318_v53 }
  0xb1   :  { %v338_v59 = vadd.f32 %v680_v23, %v301_v55 }
  0xb2   :  { %v361_v60 = vmax.f32 %v345_v58, 0.0 }
  0xb3   :  { %v354_v61 = vmax.f32 %v338_v59, 0.0 }
  0xb4   :  { %377 = vst [vmem:[#allocation2 + $0x58] sm:$0xff] %v361_v60 }
  0xb5   :  { %370 = vst [vmem:[#allocation2 + $0x20] sm:$0xff] %v354_v61  ;;  %v194_v62 = vpop.f32.mrf.mxu2 }
  0xb6   :  { %v321_v63 = vadd.f32 %v320_v57, %v194_v62  ;;  %v176_v0 = vpop.f32.mrf.mxu0  ;;  %v327_v32 = vpop.f32.mrf.mxu3 }
  0xb7   :  { %v303_v1 = vadd.f32 %v302_v56, %v176_v0  ;;  %v305_v2 = vpop.f32.mrf.mxu1 }
  0xb8   :  { %v346_v3 = vadd.f32 %v680_v23, %v321_v63 }
  0xb9   :  { %v339_v4 = vadd.f32 %v680_v23, %v303_v1 }
  0xba   :  { %v362_v6 = vmax.f32 %v346_v3, 0.0 }
  0xbb   :  { %v355_v7 = vmax.f32 %v339_v4, 0.0 }
  0xbc   :  { %378 = vst [vmem:[#allocation2 + $0x60] sm:$0xff] %v362_v6 }
  0xbd   :  { %371 = vst [vmem:[#allocation2 + $0x28] sm:$0xff] %v355_v7  ;;  %v196_v8 = vpop.f32.mrf.mxu2 }
  0xbe   :  { %v323_v9 = vadd.f32 %v322_v5, %v196_v8  ;;  %v179_v10 = vpop.f32.mrf.mxu0 }
  0xbf   :  { %v306_v11 = vadd.f32 %v305_v2, %v179_v10  ;;  %v307_v12 = vpop.f32.mrf.mxu1 }
  0xc0   :  { %v347_v13 = vadd.f32 %v680_v23, %v323_v9 }
  0xc1   :  { %v340_v14 = vadd.f32 %v680_v23, %v306_v11 }
  0xc2   :  { %v363_v15 = vmax.f32 %v347_v13, 0.0 }
  0xc3   :  { %v356_v16 = vmax.f32 %v340_v14, 0.0 }
  0xc4   :  { %379 = vst [vmem:[#allocation2 + $0x68] sm:$0xff] %v363_v15 }
  0xc5   :  { %372 = vst [vmem:[#allocation2 + $0x30] sm:$0xff] %v356_v16  ;;  %v199_v18 = vpop.f32.mrf.mxu2 }
  0xc6   :  { %v326_v19 = vadd.f32 %v325_v17, %v199_v18  ;;  %v181_v20 = vpop.f32.mrf.mxu0 }
  0xc7   :  { %v308_v21 = vadd.f32 %v307_v12, %v181_v20  ;;  %v310_v22 = vpop.f32.mrf.mxu1 }
  0xc8   :  { %v348_v24 = vadd.f32 %v680_v23, %v326_v19  ;;  %v311_v25 = vadd.f32 %v310_v22, %v683_v29 }
  0xc9   :  { %v341_v26 = vadd.f32 %v680_v23, %v308_v21 }
  0xca   :  { %v364_v27 = vmax.f32 %v348_v24, 0.0  ;;  %v342_v28 = vadd.f32 %v680_v23, %v311_v25 }
  0xcb   :  { %v357_v30 = vmax.f32 %v341_v26, 0.0 }
  0xcc   :  { %380 = vst [vmem:[#allocation2 + $0x70] sm:$0xff] %v364_v27  ;;  %v358_v31 = vmax.f32 %v342_v28, 0.0 }
  0xcd   :  { %373 = vst [vmem:[#allocation2 + $0x38] sm:$0xff] %v357_v30  ;;  %v201_v33 = vpop.f32.mrf.mxu2 }
  0xce   :  { %374 = vst [vmem:[#allocation2 + $0x40] sm:$0xff] %v358_v31  ;;  %v328_v34 = vadd.f32 %v327_v32, %v201_v33 }
  0xcf   :  { %v312_v35 = vpop.f32.mrf.mxu1 }
  0xd0   :  { %v349_v37 = vadd.f32 %v680_v23, %v328_v34  ;;  %v313_v38 = vadd.f32 %v312_v35, %v686_v36 }
  0xd2   :  { %v365_v29 = vmax.f32 %v349_v37, 0.0  ;;  %v343_v39 = vadd.f32 %v680_v23, %v313_v38 }
  0xd4   :  { %381 = vst [vmem:[#allocation2 + $0x78] sm:$0xff] %v365_v29  ;;  %v359_v40 = vmax.f32 %v343_v39, 0.0 }
  0xd6   :  { %375 = vst [vmem:[#allocation2 + $0x48] sm:$0xff] %v359_v40 }
  0xd7   :  { %394 = dma.vmem_to_hbm [thread:$0]  %s387_s2, 2048, %s389_s12, [#allocation3], %s563_s4, %s563_s4, %s564_s13  }
  0xd8   :  { %560 = dma.done.wait [#allocation3], 2048  }
  0xd9   :  { %561 = vsyncadd [#allocation3], 4294965248 }
  0xda   :  { %399 = vsyncpa [#allocation3], 1 }

</bundles_post_ra>
